<compile_context>
chip_gen: v5e
topology: v5e:2x2
jax: 0.10.0
libtpu: 0.0.40
codegen_flags: <defaults>
</compile_context>

<pallas_src>
import functools

import jax
import jax.numpy as jnp
from jax import lax
from jax.experimental import pallas as pl
from jax.experimental.pallas import tpu as pltpu


def _round_up(x, m):
    return (x + m - 1) // m * m


def _vmem_budget_bytes():
    """Per-core VMEM we allow the kernel to use: physical capacity minus headroom."""
    try:
        cap = int(pltpu.get_tpu_info().vmem_capacity_bytes)
    except Exception:
        cap = 64 << 20  # v7x has the smallest VMEM (64 MiB) -> safe fallback
    return max(cap - (8 << 20), 16 << 20)


# --------------------- single-pass kernel (whole batch element resident) ----------


def _cam_single_kernel(gamma_ref, x_ref, o_ref, *, mm_dtype):
    # gamma_ref: SMEM (1,) f32.  x_ref/o_ref: VMEM (1, C, N_pad) for one batch elem.
    x_b = x_ref[0]                                                     # (C, N_pad)
    xm = x_b if mm_dtype is None else x_b.astype(mm_dtype)

    # energy = x @ x^T, contracting the lane dim of both operands (no transpose).
    energy = lax.dot_general(
        xm, xm, dimension_numbers=(((1,), (1,)), ((), ())),
        preferred_element_type=jnp.float32)

    # softmax(rowmax(E) - E) == softmax(-E); stabilize with a row-min shift.
    z = jnp.min(energy, axis=-1, keepdims=True) - energy
    ez = jnp.exp(z)
    attn = ez / jnp.sum(ez, axis=-1, keepdims=True)                    # exact division
    attn_m = attn if mm_dtype is None else attn.astype(mm_dtype)

    out = jnp.dot(attn_m, xm, preferred_element_type=jnp.float32)
    o_ref[0] = (gamma_ref[0] * out + x_b.astype(jnp.float32)).astype(o_ref.dtype)


# --------------------- two-pass N-tiled fallback kernel ----------------------------


def _cam_twopass_kernel(gamma_ref, x_ref, o_ref, energy_ref, attn_ref, *, mm_dtype):
    # energy_ref: (C, C) f32 accumulator.  attn_ref: (C, C) in matmul-operand dtype.
    p = pl.program_id(1)            # 0: accumulate energy, 1: apply attention
    n = pl.program_id(2)            # N-tile index
    nt = pl.num_programs(2)

    x_tile = x_ref[0]                                                  # (C, tn)
    xm = x_tile if mm_dtype is None else x_tile.astype(mm_dtype)

    @pl.when(p == 0)
    def _accumulate():
        @pl.when(n == 0)
        def _init():
            energy_ref[...] = jnp.zeros_like(energy_ref)

        energy_ref[...] += lax.dot_general(
            xm, xm, dimension_numbers=(((1,), (1,)), ((), ())),
            preferred_element_type=jnp.float32)

        @pl.when(n == nt - 1)
        def _softmax():
            energy = energy_ref[...]
            z = jnp.min(energy, axis=-1, keepdims=True) - energy
            ez = jnp.exp(z)
            attn = ez / jnp.sum(ez, axis=-1, keepdims=True)
            # One-time cast to the matmul-operand dtype, hoisted out of pass 1.
            attn_ref[...] = attn.astype(attn_ref.dtype)
        # No output store in pass 0: the output block is revisited (index n*p == 0)
        # and never copied back to HBM during this pass.

    @pl.when(p == 1)
    def _apply():
        out = jnp.dot(attn_ref[...], xm, preferred_element_type=jnp.float32)
        o_ref[0] = (gamma_ref[0] * out + x_tile.astype(jnp.float32)).astype(o_ref.dtype)


# --------------------------------- wrapper -----------------------------------------


def cam_module(x, gamma, *, tn_target=2048, matmul_dtype=None, single_pass=None):
    """Channel-attention forward. x: (B, C, H, W, channle); gamma: shape (1,)."""
    B, C, H, W, D = x.shape
    N = H * W * D
    x_flat = x.reshape(B, C, N)
    dtype = x_flat.dtype
    itemsize = jnp.dtype(dtype).itemsize
    mm_itemsize = itemsize if matmul_dtype is None else jnp.dtype(matmul_dtype).itemsize

    gamma = jnp.asarray(gamma, dtype=jnp.float32).reshape(1)
    budget = _vmem_budget_bytes()
    n_pad128 = _round_up(N, 128)

    # Zero-padding is safe: padded columns contribute nothing to x @ x^T and the
    # padded output columns are sliced off below.

    # Single-pass need: double-buffered x block + double-buffered out block +
    # energy/attention temporaries + small margin.
    single_need = 4 * C * n_pad128 * itemsize + 2 * C * C * 4 + (2 << 20)
    if single_pass is None:
        single_pass = single_need <= budget - (4 << 20)

    flops = int(4 * B * C * C * n_pad128)          # two C x C x N matmuls
    transcendentals = int(B * C * C)               # exp in the softmax

    if single_pass:
        # ---------------- whole-batch-element single pass ----------------
        n_pad = n_pad128
        if n_pad != N:
            x_flat = jnp.pad(x_flat, ((0, 0), (0, 0), (0, n_pad - N)))
        vmem_limit = int(min(single_need + (8 << 20), budget))
        cost = pl.CostEstimate(
            flops=flops, transcendentals=transcendentals,
            bytes_accessed=int(2 * B * C * n_pad * itemsize),   # x read once, out once
        )
        # Note: with grid=(B,) and B == 1, one v7x TensorCore idles; splitting C row
        # blocks across cores would fix that but is not needed for v5e/v6e.
        out_flat = pl.pallas_call(
            functools.partial(_cam_single_kernel, mm_dtype=matmul_dtype),
            out_shape=jax.ShapeDtypeStruct((B, C, n_pad), dtype),
            grid=(B,),
            in_specs=[
                pl.BlockSpec(memory_space=pltpu.MemorySpace.SMEM),        # gamma
                pl.BlockSpec((1, C, n_pad), lambda b: (b, 0, 0)),         # x(b)
            ],
            out_specs=pl.BlockSpec((1, C, n_pad), lambda b: (b, 0, 0)),
            compiler_params=pltpu.CompilerParams(
                dimension_semantics=("parallel",),
                vmem_limit_bytes=vmem_limit,
            ),
            cost_estimate=cost,
        )(gamma, x_flat)
    else:
        # ---------------- two-pass N-tiled fallback ----------------
        scratch_bytes = C * C * 4 + C * C * mm_itemsize
        tn_cap = (budget - scratch_bytes - (4 << 20)) // max(4 * C * itemsize, 1)
        tn_cap = max((tn_cap // 128) * 128, 128)
        tn = max(min(_round_up(tn_target, 128), tn_cap, n_pad128), 128)
        n_pad = _round_up(N, tn)
        if n_pad != N:
            x_flat = jnp.pad(x_flat, ((0, 0), (0, 0), (0, n_pad - N)))
        nt = n_pad // tn

        need = 4 * C * tn * itemsize + scratch_bytes
        vmem_limit = int(min(max(need + (8 << 20), 32 << 20), budget))
        cost = pl.CostEstimate(
            flops=flops, transcendentals=transcendentals,
            bytes_accessed=int(3 * B * C * n_pad * itemsize),   # x read twice, out once
        )
        attn_dtype = dtype if matmul_dtype is None else matmul_dtype

        out_flat = pl.pallas_call(
            functools.partial(_cam_twopass_kernel, mm_dtype=matmul_dtype),
            out_shape=jax.ShapeDtypeStruct((B, C, n_pad), dtype),
            grid=(B, 2, nt),
            in_specs=[
                pl.BlockSpec(memory_space=pltpu.MemorySpace.SMEM),        # gamma
                pl.BlockSpec((1, C, tn), lambda b, p, n: (b, 0, n)),      # x tile
            ],
            # During p==0 every tile maps to output block (b, 0, 0): the block stays
            # resident and is never copied back (no pass-0 HBM writeback).  The first
            # block-index change happens at p==1, n==1, after real data was written.
            out_specs=pl.BlockSpec((1, C, tn), lambda b, p, n: (b, 0, n * p)),
            scratch_shapes=[
                pltpu.VMEM((C, C), jnp.float32),      # energy accumulator
                pltpu.VMEM((C, C), attn_dtype),       # attention (cast hoisted)
            ],
            compiler_params=pltpu.CompilerParams(
                dimension_semantics=("parallel", "arbitrary", "arbitrary"),
                vmem_limit_bytes=vmem_limit,
            ),
            cost_estimate=cost,
        )(gamma, x_flat)

    out_flat = out_flat[:, :, :N]
    return out_flat.reshape(B, C, H, W, D)


def cam_reference(x, gamma):
    """Pure-JAX reference mirroring the PyTorch forward, for validation."""
    B, C, H, W, D = x.shape
    q = x.reshape(B, C, -1)
    energy = jnp.einsum("bcn,bdn->bcd", q, q)
    energy_new = jnp.max(energy, axis=-1, keepdims=True) - energy
    attention = jax.nn.softmax(energy_new, axis=-1)
    out = jnp.einsum("bcd,bdn->bcn", attention, q)
    return gamma[0] * out.reshape(B, C, H, W, D) + x


if __name__ == "__main__":
    key = jax.random.PRNGKey(0)

    # Small shapes consistent with the 5-D forward: (B, C, H, W, channle)
    B, C, H, W, D = 2, 8, 8, 8, 4                  # N = 256
    x = jax.random.normal(key, (B, C, H, W, D), dtype=jnp.float32)

    # gamma = zeros(1) as in __init__ (out must equal x exactly).
    gamma0 = jnp.zeros((1,), dtype=jnp.float32)
    out0 = jax.block_until_ready(cam_module(x, gamma0))
    ref0 = cam_reference(x, gamma0)
    assert jnp.allclose(out0, ref0, atol=1e-5, rtol=1e-5)

    # Nonzero gamma, default (single-pass) path.
    gamma1 = jnp.array([0.5], dtype=jnp.float32)
    out1 = jax.block_until_ready(cam_module(x, gamma1))
    ref1 = cam_reference(x, gamma1)
    assert jnp.allclose(out1, ref1, atol=5e-3, rtol=5e-3)

    # Forced two-pass, multi-tile path (NT > 1): validates the n*p output index map
    # (the unwritten pass-0 buffer must never reach HBM) and the energy accumulation.
    out2 = jax.block_until_ready(cam_module(x, gamma1, tn_target=128, single_pass=False))
    assert jnp.allclose(out2, ref1, atol=5e-3, rtol=5e-3)

    # Non-128-multiple N exercises the zero-padding path (N = 5*6*4 = 120 -> 128).
    x3 = jax.random.normal(jax.random.PRNGKey(1), (2, 8, 5, 6, 4), dtype=jnp.float32)
    out3 = jax.block_until_ready(cam_module(x3, gamma1))
    ref3 = cam_reference(x3, gamma1)
    assert jnp.allclose(out3, ref3, atol=5e-3, rtol=5e-3)

    # Optional bf16 MXU-operand path (full-rate MXU on v6e/v7x); precision tradeoff
    # documented in the review, so only a loose sanity check against the reference.
    out4 = jax.block_until_ready(
        cam_module(x, gamma1, tn_target=128, single_pass=False, matmul_dtype=jnp.bfloat16))
    assert jnp.allclose(out4, ref1, atol=1e-1, rtol=1e-1)

    print("KERNEL_OK")
</pallas_src>

<mosaic_0001>
module attributes {stable_mosaic.version = 11 : i64} {
  func.func @_cam_single_kernel(%arg0: i32, %arg1: memref<1xf32, #tpu.memory_space<smem>>, %arg2: memref<1x8x256xf32, #tpu.memory_space<vmem>>, %arg3: memref<1x8x256xf32, #tpu.memory_space<vmem>>) attributes {dimension_semantics = [#tpu.dimension_semantics<parallel>], iteration_bounds = array<i64: 2>, scalar_prefetch = 0 : i64, scratch_operands = 0 : i64, tpu.core_type = #tpu.core_type<tc>, window_params = [{transform_indices = @transform_0, window_bounds = array<i64: 1>}, {transform_indices = @transform_1, window_bounds = array<i64: 1, 8, 256>}, {transform_indices = @transform_2, window_bounds = array<i64: 1, 8, 256>}]} {
    %c0 = arith.constant 0 : index
    %c0_0 = arith.constant 0 : index
    %c0_1 = arith.constant 0 : index
    %0 = vector.load %arg2[%c0, %c0_0, %c0_1] : memref<1x8x256xf32, #tpu.memory_space<vmem>>, vector<1x8x256xf32>
    %1 = vector.shape_cast %0 : vector<1x8x256xf32> to vector<8x256xf32>
    %cst = arith.constant dense<0.000000e+00> : vector<8x8xf32>
    %2 = tpu.matmul %1, %1, %cst {dimension_numbers = #tpu.dot_dimension_numbers<[1], [1], [0], [0], [0, 0, 1, 0], [], []>} : vector<8x256xf32>, vector<8x256xf32>, vector<8x8xf32> -> vector<8x8xf32>
    %cst_2 = arith.constant dense<0x7F800000> : vector<8xf32>
    %3 = vector.multi_reduction <minimumf>, %2, %cst_2 [1] : vector<8x8xf32> to vector<8xf32>
    %4 = vector.shape_cast %3 : vector<8xf32> to vector<8x1xf32>
    %5 = vector.broadcast %4 : vector<8x1xf32> to vector<8x8xf32>
    %6 = arith.subf %5, %2 : vector<8x8xf32>
    %7 = math.exp %6 : vector<8x8xf32>
    %cst_3 = arith.constant dense<0.000000e+00> : vector<8xf32>
    %8 = vector.multi_reduction <add>, %7, %cst_3 [1] : vector<8x8xf32> to vector<8xf32>
    %9 = vector.shape_cast %8 : vector<8xf32> to vector<8x1xf32>
    %10 = vector.broadcast %9 : vector<8x1xf32> to vector<8x8xf32>
    %11 = arith.divf %7, %10 : vector<8x8xf32>
    %cst_4 = arith.constant dense<0.000000e+00> : vector<8x256xf32>
    %12 = tpu.matmul %11, %1, %cst_4 {dimension_numbers = #tpu.dot_dimension_numbers<[1], [0], [0], [1], [0, 0, 1, 1], [], []>} : vector<8x8xf32>, vector<8x256xf32>, vector<8x256xf32> -> vector<8x256xf32>
    %c0_5 = arith.constant 0 : index
    %13 = memref.load %arg1[%c0_5] : memref<1xf32, #tpu.memory_space<smem>>
    %14 = vector.broadcast %13 : f32 to vector<8x256xf32>
    %15 = arith.mulf %14, %12 : vector<8x256xf32>
    %16 = arith.addf %15, %1 : vector<8x256xf32>
    %c0_6 = arith.constant 0 : index
    %c0_7 = arith.constant 0 : index
    %c0_8 = arith.constant 0 : index
    %17 = vector.load %arg3[%c0_6, %c0_7, %c0_8] : memref<1x8x256xf32, #tpu.memory_space<vmem>>, vector<1x8x256xf32>
    %18 = vector.shape_cast %17 : vector<1x8x256xf32> to vector<8x256xf32>
    %19 = vector.shape_cast %16 : vector<8x256xf32> to vector<1x8x256xf32>
    tpu.vector_store %arg3[%c0_6, %c0_7, %c0_8], %19 {strides = array<i32>} : memref<1x8x256xf32, #tpu.memory_space<vmem>>, vector<1x8x256xf32>,
    return
  }
  func.func @transform_0(%arg0: i32) -> i32 {
    %c0_i32 = arith.constant 0 : i32
    %c0_i32_0 = arith.constant 0 : i32
    return %c0_i32 : i32
  }
  func.func @transform_1(%arg0: i32) -> (i32, i32, i32) {
    %c0_i32 = arith.constant 0 : i32
    %c0_i32_0 = arith.constant 0 : i32
    %c0_i32_1 = arith.constant 0 : i32
    return %arg0, %c0_i32, %c0_i32_0 : i32, i32, i32
  }
  func.func @transform_2(%arg0: i32) -> (i32, i32, i32) {
    %c0_i32 = arith.constant 0 : i32
    %c0_i32_0 = arith.constant 0 : i32
    %c0_i32_1 = arith.constant 0 : i32
    return %arg0, %c0_i32, %c0_i32_0 : i32, i32, i32
  }
}

</mosaic_0001>

<bundles_post_ra>
// kernel: tpu_custom_call.1
= control target key start
LH: loop header
LB: loop body
LE: loop exit
PB: predicated region body
PF: predicated region fallthrough
CT: control target
= control target key end

     0   :  { %s687_s0 = inlined_call_operand.<no memory space> [shape: f32[1], index: 0, kind: input, shape index: {}]   ;;  %s688_s1 = inlined_call_operand.hbm [shape: f32[2,8,256], index: 1, kind: input, shape index: {}]   ;;  %s689_s2 = inlined_call_operand.hbm [shape: f32[2,8,256], index: 2, kind: output, shape index: {}]  }
   0x1   :  { %7 = sst [smem:[#allocation2]] %s687_s0 }
   0x2   :  { %8 = vsyncpa [#allocation4], 0 }
   0x3   :  { %10 = vsyncpa [#allocation4 + $0x1], 0 }
   0x4   :  { %11 = vsyncpa [#allocation5], 0 }
   0x5   :  { %13 = vsyncpa [#allocation5 + $0x1], 0  ;;  %s552_s11 = smov 0   ;;  %s554_s12 = smov 0  }
   0x6   :  { %s556_s13 = smov 0   ;;  %s558_s14 = smov 0  }
   0x7 LB: > { %s573_s0 = sadd.s32 4294967295, %s532_s14   ;;  %s368_s15 = sadd.s32 4294967294, %s532_s14   ;;  %s532_s14 = sphi %s558_s14, %s699_s14   ;;  %s528_s13 = sphi %s556_s13, %s698_s13   ;;  %s524_s12 = sphi %s554_s12, %s697_s12   ;;  %s520_s11 = sphi %s552_s11, %s696_s11  }
   0x8   : > { %s577_s16 = sadd.s32 1, %s532_s14   ;;  %s47_s17 = sadd.s32 1, %s528_s13 }
   0x9   : > { %s44_s18 = ssub.s32 %s532_s14, %s577_s16  ;;  %p54_p0 = scmp.ne.s32.totalorder %s528_s13, %s524_s12 }
   0xa   : > { %p45_p1 = scmp.eq.s32.totalorder %s44_s18, 0  ;;  %p55_p2 = scmp.eq.s32.totalorder %s532_s14, 0 }
   0xb   : > { %p60_p3 = scmp.ne.s32.totalorder %s524_s12, %s520_s11  ;;  %p61_p4 = scmp.eq.s32.totalorder %s573_s0, 0 }
   0xc   : > { %s589_s19 = scalar_select %p45_p1, %s528_s13, %s47_s17  }
   0xd   : > { %p591_p5 = por %p55_p2, %p54_p0  ;;  %p595_p6 = por %p61_p4, %p60_p3 }
   0xe   : > { %p84_p7 = scmp.eq.s32.totalorder %s573_s0, 1  ;;  %p90_p8 = scmp.eq.s32.totalorder %s368_s15, 1 }
   0xf   : > { %p398_p10 = scmp.lt.s32.totalorder %s532_s14, 2  ;;  %s113_s24 = sand.u32 1, %s528_s13  }
  0x10   : > { %p602_p11 = por %p84_p7, %p54_p0  ;;  %p606_p12 = por %p90_p8, %p60_p3 }
  0x11   : > { %s384_s25 = sshll.u32 %s532_s14, 4  ;;  %s371_s26 = sshll.u32 %s113_s24, 4 }
  0x12   : > { %s122_s29 = scalar_lea.hbm %s688_s1, %s384_s25  ;;  %s117_s3 = scalar_lea.vmem [#allocation3], %s371_s26 }
  0x13   : > { %s124_s30 = sshll.u32 %s122_s29, 4  ;;  %s126_s4 = sshll.u32 %s117_s3, 4  ;;  %s125_s30 = int_to_ptr.hbm [resolvable:$true] %s124_s30  ;;  %s127_s4 = int_to_ptr.vmem [resolvable:$true] %s126_s4 }
  0x14   : > { %p617_p13 = pnand %p398_p10, %p591_p5  ;;  %p374_p0 = scmp.ge.s32.totalorder %s532_s14, 1 }
  0x15   : > { %p131_p1 = scmp.lt.s32.totalorder %s532_s14, 3  ;;  %s114_s6 = scalar_lea.sflag [#allocation4], %s113_s24 }
  0x16   : > { %s436_s7 = sshra.s32 %s125_s30, 4  ;;  %p440_p3 = pneg %p617_p13  ;;  %s437_s7 = int_to_ptr.hbm [resolvable:$true] %s436_s7 }
  0x17   : > { %s438_s8 = scalar_lea.hbm %s437_s7, 16  ;;  %s443_s15 = scalar_lea.hbm %s688_s1, 32 }
  0x18   : > { %p439_p2 = scmp.ne.s32.totalorder %s437_s7, %s438_s8  ;;  %p444_p5 = scmp.lt.s32.totalorder %s437_s7, %s688_s1 }
  0x19   : > { %p445_p8 = scmp.lt.s32.totalorder %s443_s15, %s438_s8 }
  0x1a   : > { %p441_p4 = pnand %p440_p3, %p439_p2 }
  0x1b   : > { %p446_p10 = por %p445_p8, %p444_p5 }
  0x1c   : > { %p442_p7 = pneg %p441_p4 }
  0x1e   : > { %p447_p9 = pnand %p446_p10, %p442_p7 }
  0x20   : > { %450 = shalt.err (!%p447_p9)
}
  0x21   : > { %393 = dma.hbm_to_vmem [thread:$0]  (!%p617_p13), %s125_s30, 256, %s127_s4, %s114_s6  }
  0x22   : > { %p132_p2 = pnand %p374_p0, %p131_p1 }
  0x23   : > { %s638_s20 = sand.u32 (!%p132_p2), 1, %s524_s12  }
  0x24   : > { %135 = sbr.rel (%p132_p2) target bundleno = 578 (0x242), region = 28  ;;  %s375_s24 = sshll.u32 (!%p132_p2), %s638_s20, 4 }
  0x25   : > { %s138_s25 = scalar_lea.sflag (!%p132_p2), [#allocation4], %s638_s20  ;;  %s141_s26 = scalar_lea.vmem (!%p132_p2), [#allocation3], %s375_s24 }
  0x29   : > { %511 = dma.done.wait (%p595_p6), %s138_s25, 256  }
  0x2a   : > { %513 = vsyncadd (%p595_p6), %s138_s25, 4294967040  ;;  %v163_v0 = vld [vmem:[%s141_s26] sm:$0xff]  ;;  %v164_v1 = vld [vmem:[%s141_s26 + $0x8] sm:$0xff]  ;;  %vm205_vm0 = vcmask 64512   ;;  %s273_s21 = sld [smem:[#allocation2]]  ;;  %s385_s27 = sshll.u32 %s573_s0, 4 }
  0x2b   : > { %180 = vmatpush.xpose.msra.mxu0 %v163_v0  ;;  %200 = vmatpush.xpose.msra.mxu1 %v164_v1  ;;  %s293_s30 = scalar_lea.hbm %s689_s2, %s385_s27  ;;  %s162_s3 = scalar_lea.vmem [#allocation6], %s375_s24 }
  0x2c   : > { %248 = vmatpush.msra.mxu2 %v163_v0  ;;  %268 = vmatpush.msra.mxu3 %v164_v1  ;;  %s295_s4 = sshll.u32 %s162_s3, 4  ;;  %s297_s5 = sshll.u32 %s293_s30, 4  ;;  %s296_s4 = int_to_ptr.vmem [resolvable:$true] %s295_s4  ;;  %s298_s5 = int_to_ptr.hbm [resolvable:$true] %s297_s5 }
  0x2d   : > { %s282_s0 = scalar_lea.sflag [#allocation5], %s638_s20  ;;  %s480_s6 = sshra.s32 %s298_s5, 4  ;;  %s481_s6 = int_to_ptr.hbm [resolvable:$true] %s480_s6 }
  0x2e   : > { %181 = vmatmul.f32.vlgmr.msra.gmra.mxu0 %v163_v0  ;;  %201 = vmatmul.f32.vlgmr.msra.gmra.mxu1 %v164_v1  ;;  %s482_s7 = scalar_lea.hbm %s481_s6, 16  ;;  %s486_s10 = scalar_lea.hbm %s689_s2, 32 }
  0x2f   : > { %p483_p6 = scmp.ne.s32.totalorder %s481_s6, %s482_s7  ;;  %p487_p0 = scmp.lt.s32.totalorder %s481_s6, %s689_s2 }
  0x30   : > { %v274_v23 = vstv %s273_s21  ;;  %p488_p1 = scmp.lt.s32.totalorder %s486_s10, %s482_s7 }
  0x31   : > { %p484_p9 = pnand %p483_p6, %p602_p11 }
  0x32   : > { %p489_p3 = por %p488_p1, %p487_p0 }
  0x33   : > { %p485_p13 = pneg %p484_p9 }
  0x35   : > { %p490_p4 = pnand %p489_p3, %p485_p13 }
  0xab   : > { %v182_v2 = vpop.f32.mrf.mxu0  ;;  %v202_v3 = vpop.f32.mrf.mxu1 }
  0xac   : > { %v203_v4 = vadd.f32 %v202_v3, %v182_v2 }
  0xae   : > { %v206_v5 = vsel %vm205_vm0, %v203_v4, inf }
  0xaf   : > { %207 = vmin.xlane.f32.xlu0 %v206_v5 }
 0x122   : > { %v208_v6 = vpop.xlane.xlu0 %207 }
 0x123   : > { %v209_v7 = vsub.f32 %v208_v6, %v203_v4 }
 0x125   : > { %v210_v8 = vmul.f32 1.442695, %v209_v7 }
 0x127   : > { %432 = vpow2.f32 %v210_v8 }
 0x12d   : > { %v433_v9 = vpop.eup %432 }
 0x12e   : > { %v212_v10 = vsel %vm205_vm0, %v433_v9, 0.0 }
 0x12f   : > { %213 = vadd.xlane.f32.xlu0 %v212_v10 }
 0x1a2   : > { %v214_v11 = vpop.xlane.xlu0 %213 }
 0x1a3   : > { %434 = vrcp.f32 %v214_v11  ;;  %v226_v15 = vand.u32 2147483648, %v214_v11  ;;  %v224_v17 = vand.u32 2147483647, %v214_v11  ;;  %vm220_vm2 = vweird.f32 %v214_v11 }
 0x1a5   : > { %v227_v19 = vor.u32 1.1754944e-38, %v226_v15  ;;  %vm225_vm4 = vcmp.eq.f32.partialorder %v224_v17, 8.507059e+37 }
 0x1a9   : > { %v435_v12 = vpop.eup %434 }
 0x1aa   : > { %v216_v13 = vmul.f32 %v435_v12, %v214_v11  ;;  %vm221_vm1 = vweird.f32 %v435_v12 }
 0x1ab   : > { %vm222_vm3 = vmor %vm220_vm2, %vm221_vm1 }
 0x1ac   : > { %v217_v14 = vsub.f32 1.0, %v216_v13 }
 0x1ae   : > { %v218_v16 = vmul.f32 %v435_v12, %v217_v14 }
 0x1b0   : > { %v219_v18 = vadd.f32 %v435_v12, %v218_v16 }
 0x1b2   : > { %v223_v20 = vsel %vm222_vm3, %v435_v12, %v219_v18 }
 0x1b3   : > { %v228_v21 = vsel %vm225_vm4, %v227_v19, %v223_v20 }
 0x1b4   : > { %v229_v22 = vmul.f32 %v433_v9, %v228_v21 }
 0x1b6   : > { %377 = vmatmul.msk.f32.vlgmr.msra.gmra.mxu2 %vm205_vm0, %v229_v22  ;;  %378 = vmatmul.msk.f32.vlgmr.msra.gmra.mxu3 %vm205_vm0, %v229_v22 }
 0x239   : > { %v250_v24 = vpop.f32.mrf.mxu2  ;;  %v270_v25 = vpop.f32.mrf.mxu3 }
 0x23a   : > { %v275_v26 = vmul.f32 %v274_v23, %v250_v24  ;;  %v276_v27 = vmul.f32 %v274_v23, %v270_v25 }
 0x23c   : > { %v277_v28 = vadd.f32 %v275_v26, %v163_v0  ;;  %v278_v29 = vadd.f32 %v276_v27, %v164_v1 }
 0x23e   : > { %279 = vst [vmem:[%s162_s3] sm:$0xff] %v277_v28 }
 0x23f   : > { %280 = vst [vmem:[%s162_s3 + $0x8] sm:$0xff] %v278_v29 }
 0x240   : > { %493 = shalt.err (!%p490_p4)
}
 0x241   : > { %388 = dma.vmem_to_hbm [thread:$0]  (%p602_p11), %s296_s4, 256, %s298_s5, %s282_s0  }
 0x242 PF: > { %s309_s18 = sand.u32 1, %s520_s11   ;;  %p695_p7 = scmp.ge.s32.totalorder %s532_s14, 2 }
 0x243   : > { %s310_s20 = scalar_lea.sflag [#allocation5], %s309_s18 }
 0x244   : > { %p395_p5 = pnand %p695_p7, %p606_p12 }
 0x246   : > { %p396_p8 = pneg %p395_p5 }
 0x248   : > { %515 = dma.done.wait (%p396_p8), %s310_s20, 256  }
 0x249   : > { %517 = vsyncadd (%p396_p8), %s310_s20, 4294967040  ;;  %p16_p10 = scmp.ge.s32.totalorder %s577_s16, 4   ;;  %s696_s11 = smov %s524_s12 }
 0x24a   : > { %s697_s12 = smov %s528_s13  ;;  %s698_s13 = smov %s589_s19 }
 0x24b   : > { %s699_s14 = smov %s577_s16  ;;  %18 = sbr.rel (!%p16_p10) target bundleno = 7 (0x7), region = 73 }
 0x250   :  { %316 = vsyncpa [#allocation4], 1 }
 0x251   :  { %318 = vsyncpa [#allocation4 + $0x1], 1 }
 0x252   :  { %319 = vsyncpa [#allocation5], 1 }
 0x253   :  { %321 = vsyncpa [#allocation5 + $0x1], 1 }

</bundles_post_ra>
